<compile_context>
chip_gen: v5e
topology: v5e:2x2
jax: 0.10.0
libtpu: 0.0.40
codegen_flags: <defaults>
</compile_context>

<pallas_src>
import functools
import math

import jax
import jax.numpy as jnp
from jax.experimental import pallas as pl
from jax.experimental.pallas import tpu as pltpu

_MIB = 1024 * 1024
# Per-call VMEM budget used when picking the spatial tile size.  Sized so the
# worst case (double-buffered x/out tiles + resident fused weights + f32
# intermediates) stays well inside v7x's 64 MiB physical VMEM.
_TILE_VMEM_BUDGET = 40 * _MIB


def _round_up(n, m):
    return ((n + m - 1) // m) * m


def _pad_rows(a, rows):
    pad = rows - a.shape[0]
    if pad == 0:
        return a
    return jnp.pad(a, ((0, pad),) + ((0, 0),) * (a.ndim - 1))


def _pick_ts(N, per_lane_bytes, fixed_bytes, target):
    """Spatial (lane) tile: multiple of 128, fits the VMEM budget, and prefers
    the largest multiple of 128 that divides N (keeps every store full-width,
    no ragged masked last block)."""
    target = max(128, _round_up(int(target), 128))
    avail = max(_TILE_VMEM_BUDGET - fixed_bytes, 128 * per_lane_bytes)
    cap = (avail // max(per_lane_bytes, 1)) // 128 * 128
    cap = max(128, min(cap, target, _round_up(N, 128)))
    best = 0
    t = 128
    while t <= cap:
        if N % t == 0:
            best = t
        t += 128
    return best if best else cap


def _glu_epilogue(r, c_out, out_dtype):
    # r: (2*C_out_p, ts) f32 bias-added fused result; top half = map(x),
    # bottom half = map_gate(x).  C_out_p is a multiple of 8, so both slices
    # stay sublane-tile aligned (no relayout copies).
    half = r.shape[0] // 2
    y = r[:half, :]
    g = r[half:, :]
    # sigmoid = exp (EUP) + approx reciprocal (EUP vrcp): keeps VALU slots
    # free for the gating multiply and the output cast.
    gate = pl.reciprocal(1.0 + jnp.exp(-g), approx=True)
    out = y * gate
    if half != c_out:                      # drop alignment-padding rows
        out = out[:c_out, :]
    return out.astype(out_dtype)


def _glu_kernel_resident(x_ref, w_ref, b_ref, o_ref):
    # x_ref: (C_in, ts)        spatial tile of one batch element
    # w_ref: (2*C_out_p, C_in) fused [W; W_gate], resident (single-buffered)
    # b_ref: (2*C_out_p, 1)    fused f32 bias, resident
    # o_ref: (C_out, ts)       lane-dense output tile
    r = jnp.dot(w_ref[...], x_ref[...], preferred_element_type=jnp.float32)
    o_ref[...] = _glu_epilogue(r + b_ref[...], o_ref.shape[0], o_ref.dtype)


def _glu_kernel_ktiled(x_ref, w_ref, b_ref, o_ref, acc_ref):
    # Large-C_in path: accumulate partial products over the trailing
    # "arbitrary" grid axis into an f32 VMEM scratch, finalize once.
    k = pl.program_id(2)

    @pl.when(k == 0)
    def _():
        acc_ref[...] = jnp.zeros_like(acc_ref)

    acc_ref[...] += jnp.dot(w_ref[...], x_ref[...],
                            preferred_element_type=jnp.float32)

    @pl.when(k == pl.num_programs(2) - 1)
    def _():
        o_ref[...] = _glu_epilogue(acc_ref[...] + b_ref[...],
                                   o_ref.shape[0], o_ref.dtype)


@functools.partial(jax.jit,
                   static_argnames=("ts", "max_resident_weight_bytes"))
def glu_forward(x, w, b, wg, bg, *, ts=None,
                max_resident_weight_bytes=4 * _MIB):
    """GLU forward. x: (B, C_in, *spatial) -> (B, C_out, *spatial).

    ts: optional spatial (lane) tile target (multiple of 128); auto-sized
        from the VMEM budget when None.
    max_resident_weight_bytes: above this fused-weight size (and if C_in is
        128-aligned) the K-tiled accumulator path replaces the fully-resident
        fused weights.
    """
    B, C_in = x.shape[0], x.shape[1]
    spatial = x.shape[2:]
    N = math.prod(spatial) if spatial else 1
    C_out = w.shape[0]
    C_out_p = _round_up(C_out, 8)      # keep the y/gate split tile-aligned
    M = 2 * C_out_p

    # Free reshape (no transpose): channels stay the sublane axis, spatial is
    # flattened onto the lane axis.
    x3 = x.reshape(B, C_in, N)

    # Fused weights / bias.  Weights cast to the activation dtype so bf16
    # models feed the MXU natively (documented precision decision); bias kept
    # f32 for the f32 epilogue.  Row-padding to C_out_p is zeros (discarded in
    # the kernel epilogue).
    wcat = jnp.concatenate(
        [_pad_rows(w, C_out_p), _pad_rows(wg, C_out_p)], axis=0).astype(x.dtype)
    bcat = jnp.concatenate(
        [_pad_rows(b.reshape(C_out, 1), C_out_p),
         _pad_rows(bg.reshape(C_out, 1), C_out_p)],
        axis=0).astype(jnp.float32)

    isz = jnp.dtype(x.dtype).itemsize
    w_bytes = M * C_in * isz
    use_ktiled = (C_in % 128 == 0 and C_in >= 256
                  and w_bytes > max_resident_weight_bytes)

    target_ts = 2048 if ts is None else ts   # HBM-bound regime: big lane tiles

    if use_ktiled:
        # K tile: largest multiple of 128 dividing C_in that still gives >= 2
        # reduction steps (so the per-step weight working set actually shrinks).
        tk = 128
        for cand in (512, 256):
            if C_in % cand == 0 and C_in // cand >= 2:
                tk = cand
                break
        per_lane = 2 * tk * isz + 2 * C_out * isz + 2 * M * 4   # x, out, acc/epi
        fixed = 2 * M * tk * isz + M * 4                        # 2x W tiles, bias
    else:
        per_lane = 2 * C_in * isz + 2 * C_out * isz + 2 * M * 4
        fixed = M * C_in * isz + M * 4                          # 1x W, 1x bias

    ts_sel = _pick_ts(N, per_lane, fixed, target_ts)
    est_vmem = fixed + ts_sel * per_lane
    # Explicit scoped-VMEM limit: never below 32 MiB (>= every chip's default
    # scoped limit), 1.5x headroom over the estimate, capped under v7x's
    # 64 MiB physical VMEM.
    vmem_limit = int(min(48 * _MIB,
                         max(32 * _MIB, est_vmem + est_vmem // 2 + 2 * _MIB)))

    n_t = pl.cdiv(N, ts_sel)

    if use_ktiled:
        grid = (n_t, B, C_in // tk)            # reduction axis last
        kernel = _glu_kernel_ktiled
        in_specs = [
            pl.BlockSpec((None, tk, ts_sel), lambda s, bb, k: (bb, k, s)),
            pl.BlockSpec((M, tk), lambda s, bb, k: (0, k)),
            pl.BlockSpec((M, 1), lambda s, bb, k: (0, 0),
                         pipeline_mode=pl.Buffered(1)),
        ]
        out_specs = pl.BlockSpec((None, C_out, ts_sel),
                                 lambda s, bb, k: (bb, 0, s))
        scratch_shapes = [pltpu.VMEM((M, ts_sel), jnp.float32)]
        dims = ("parallel", "parallel", "arbitrary")
    else:
        grid = (n_t, B)                        # long spatial axis first (megacore)
        kernel = _glu_kernel_resident
        in_specs = [
            # TODO(synk): sweep pl.Buffered(3) on this spec if DMA is exposed.
            pl.BlockSpec((None, C_in, ts_sel), lambda s, bb: (bb, 0, s)),
            # Constant-index fused weight/bias: single-buffered residents.
            pl.BlockSpec((M, C_in), lambda s, bb: (0, 0),
                         pipeline_mode=pl.Buffered(1)),
            pl.BlockSpec((M, 1), lambda s, bb: (0, 0),
                         pipeline_mode=pl.Buffered(1)),
        ]
        out_specs = pl.BlockSpec((None, C_out, ts_sel),
                                 lambda s, bb: (bb, 0, s))
        scratch_shapes = []
        dims = ("parallel", "parallel")

    out3 = pl.pallas_call(
        kernel,
        out_shape=jax.ShapeDtypeStruct((B, C_out, N), x.dtype),
        grid_spec=pltpu.PrefetchScalarGridSpec(
            num_scalar_prefetch=0,
            grid=grid,
            in_specs=in_specs,
            out_specs=out_specs,
            scratch_shapes=scratch_shapes,
        ),
        compiler_params=pltpu.CompilerParams(
            dimension_semantics=dims,
            vmem_limit_bytes=vmem_limit),
    )(x3, wcat, bcat)

    return out3.reshape((B, C_out) + spatial)


def _init_linear(key, out_features, in_features):
    # nn.Linear default init: U(-1/sqrt(in_features), +1/sqrt(in_features)).
    kw, kb = jax.random.split(key)
    bound = 1.0 / math.sqrt(in_features)
    w = jax.random.uniform(kw, (out_features, in_features), jnp.float32,
                           -bound, bound)
    b = jax.random.uniform(kb, (out_features,), jnp.float32, -bound, bound)
    return w, b


def _run_case(key, B, C_in, C_out, H, W, atol, **kw):
    kx, k1, k2 = jax.random.split(key, 3)
    x = jax.random.normal(kx, (B, C_in, H, W), jnp.float32)
    w, b = _init_linear(k1, C_out, C_in)          # self.map
    wg, bg = _init_linear(k2, C_out, C_in)        # self.map_gate

    out = glu_forward(x, w, b, wg, bg, **kw)
    out = jax.block_until_ready(out)

    # Plain-JAX reference (same math, acting on the channel axis of NCHW).
    y_ref = jnp.einsum("oc,bchw->bohw", w, x) + b[None, :, None, None]
    g_ref = jnp.einsum("oc,bchw->bohw", wg, x) + bg[None, :, None, None]
    ref = y_ref * jax.nn.sigmoid(g_ref)

    assert out.shape == (B, C_out, H, W)
    err = float(jnp.max(jnp.abs(out - ref)))
    assert jnp.allclose(out, ref, atol=atol, rtol=atol), err


if __name__ == "__main__":
    key = jax.random.PRNGKey(0)
    k1, k2 = jax.random.split(key)

    # Small-channel case (module-docstring regime): resident-weight path,
    # ts picked as a divisor of N (= 256) -> full-width unmasked stores.
    _run_case(k1, B=2, C_in=4, C_out=8, H=16, W=16, atol=5e-3)

    # Larger-channel case: forces the K-tiled accumulator path (2 reduction
    # steps over C_in=256) and exercises the C_out -> multiple-of-8 padding.
    _run_case(k2, B=2, C_in=256, C_out=20, H=16, W=8, atol=1e-2,
              max_resident_weight_bytes=1)

    print("KERNEL_OK")
</pallas_src>

<mosaic_0001>
module attributes {stable_mosaic.version = 11 : i64} {
  func.func @_glu_kernel_resident(%arg0: i32, %arg1: i32, %arg2: memref<1x4x256xf32, #tpu.memory_space<vmem>>, %arg3: memref<16x4xf32, #tpu.memory_space<vmem>>, %arg4: memref<16x1xf32, #tpu.memory_space<vmem>>, %arg5: memref<1x8x256xf32, #tpu.memory_space<vmem>>) attributes {dimension_semantics = [#tpu.dimension_semantics<parallel>, #tpu.dimension_semantics<parallel>], iteration_bounds = array<i64: 1, 2>, scalar_prefetch = 0 : i64, scratch_operands = 0 : i64, tpu.core_type = #tpu.core_type<tc>, window_params = [{transform_indices = @transform_0, window_bounds = array<i64: 1, 4, 256>}, {pipeline_mode = #tpu.pipeline_mode<synchronous>, transform_indices = @transform_1, window_bounds = array<i64: 16, 4>}, {pipeline_mode = #tpu.pipeline_mode<synchronous>, transform_indices = @transform_2, window_bounds = array<i64: 16, 1>}, {transform_indices = @transform_3, window_bounds = array<i64: 1, 8, 256>}]} {
    %c0 = arith.constant 0 : index
    %c0_0 = arith.constant 0 : index
    %0 = vector.load %arg3[%c0, %c0_0] : memref<16x4xf32, #tpu.memory_space<vmem>>, vector<16x4xf32>
    %c0_1 = arith.constant 0 : index
    %c0_2 = arith.constant 0 : index
    %c0_3 = arith.constant 0 : index
    %1 = vector.load %arg2[%c0_1, %c0_2, %c0_3] : memref<1x4x256xf32, #tpu.memory_space<vmem>>, vector<1x4x256xf32>
    %2 = vector.shape_cast %1 : vector<1x4x256xf32> to vector<4x256xf32>
    %cst = arith.constant dense<0.000000e+00> : vector<16x256xf32>
    %3 = tpu.matmul %0, %2, %cst {dimension_numbers = #tpu.dot_dimension_numbers<[1], [0], [0], [1], [0, 0, 1, 1], [], []>} : vector<16x4xf32>, vector<4x256xf32>, vector<16x256xf32> -> vector<16x256xf32>
    %c0_4 = arith.constant 0 : index
    %c0_5 = arith.constant 0 : index
    %4 = vector.load %arg4[%c0_4, %c0_5] : memref<16x1xf32, #tpu.memory_space<vmem>>, vector<16x1xf32>
    %5 = vector.broadcast %4 : vector<16x1xf32> to vector<16x256xf32>
    %6 = arith.addf %3, %5 : vector<16x256xf32>
    %7 = vector.extract_strided_slice %6 {offsets = [0, 0], sizes = [8, 256], strides = [1, 1]} : vector<16x256xf32> to vector<8x256xf32>
    %8 = vector.extract_strided_slice %6 {offsets = [8, 0], sizes = [8, 256], strides = [1, 1]} : vector<16x256xf32> to vector<8x256xf32>
    %cst_6 = arith.constant 0.000000e+00 : f32
    %9 = vector.broadcast %cst_6 : f32 to vector<8x256xf32>
    %10 = arith.subf %9, %8 : vector<8x256xf32>
    %11 = math.exp %10 : vector<8x256xf32>
    %cst_7 = arith.constant 1.000000e+00 : f32
    %12 = vector.broadcast %cst_7 : f32 to vector<8x256xf32>
    %13 = arith.addf %12, %11 : vector<8x256xf32>
    %14 = tpu.reciprocal %13 {approx = true} : vector<8x256xf32> -> vector<8x256xf32>
    %15 = arith.mulf %7, %14 : vector<8x256xf32>
    %c0_8 = arith.constant 0 : index
    %c0_9 = arith.constant 0 : index
    %c0_10 = arith.constant 0 : index
    %16 = vector.load %arg5[%c0_8, %c0_9, %c0_10] : memref<1x8x256xf32, #tpu.memory_space<vmem>>, vector<1x8x256xf32>
    %17 = vector.shape_cast %16 : vector<1x8x256xf32> to vector<8x256xf32>
    %18 = vector.shape_cast %15 : vector<8x256xf32> to vector<1x8x256xf32>
    tpu.vector_store %arg5[%c0_8, %c0_9, %c0_10], %18 {strides = array<i32>} : memref<1x8x256xf32, #tpu.memory_space<vmem>>, vector<1x8x256xf32>,
    return
  }
  func.func @transform_0(%arg0: i32, %arg1: i32) -> (i32, i32, i32) {
    %c0_i32 = arith.constant 0 : i32
    %c0_i32_0 = arith.constant 0 : i32
    return %arg1, %c0_i32, %arg0 : i32, i32, i32
  }
  func.func @transform_1(%arg0: i32, %arg1: i32) -> (i32, i32) {
    %c0_i32 = arith.constant 0 : i32
    %c0_i32_0 = arith.constant 0 : i32
    %c0_i32_1 = arith.constant 0 : i32
    return %c0_i32, %c0_i32_0 : i32, i32
  }
  func.func @transform_2(%arg0: i32, %arg1: i32) -> (i32, i32) {
    %c0_i32 = arith.constant 0 : i32
    %c0_i32_0 = arith.constant 0 : i32
    %c0_i32_1 = arith.constant 0 : i32
    return %c0_i32, %c0_i32_0 : i32, i32
  }
  func.func @transform_3(%arg0: i32, %arg1: i32) -> (i32, i32, i32) {
    %c0_i32 = arith.constant 0 : i32
    %c0_i32_0 = arith.constant 0 : i32
    return %arg1, %c0_i32, %arg0 : i32, i32, i32
  }
}

</mosaic_0001>

<bundles_post_ra>
// kernel: glu_forward.1
= control target key start
LH: loop header
LB: loop body
LE: loop exit
PB: predicated region body
PF: predicated region fallthrough
CT: control target
= control target key end

     0   :  { %s488_s12 = smov 0   ;;  %s490_s13 = smov 0   ;;  %s537_s0 = inlined_call_operand.vmem [shape: f32[2,4,256], index: 0, kind: input, shape index: {}]   ;;  %s538_s1 = inlined_call_operand.vmem [shape: f32[16,4], index: 1, kind: input, shape index: {}]   ;;  %s539_s2 = inlined_call_operand.vmem [shape: f32[16,1], index: 2, kind: input, shape index: {}]   ;;  %s540_s3 = inlined_call_operand.vmem [shape: f32[2,8,256], index: 3, kind: output, shape index: {}]  }
   0x1   :  { %s492_s14 = smov 0  }
   0x2 LB: > { %s22_s15 = sadd.s32 1, %s461_s13  ;;  %p392_p0 = scmp.ge.s32.totalorder %s465_s14, 1  ;;  %s465_s14 = sphi %s492_s14, %s13_s14   ;;  %s461_s13 = sphi %s490_s13, %s542_s13   ;;  %s457_s12 = sphi %s488_s12, %s541_s12  }
   0x3   : > { %p23_p1 = scmp.ge.s32.totalorder %s22_s15, 2  ;;  %p158_p2 = scmp.lt.s32.totalorder %s465_s14, 3 }
   0x5   : > { %s544_s15 = smov (%p23_p1, %s22_s15), 0  ;;  %p159_p3 = pnand %p392_p0, %p158_p2 }
   0x6   : > { %p191_p4 = scmp.lt.s32.totalorder (!%p159_p3), %s457_s12, 1 }
   0x7   : > { %162 = sbr.rel (%p159_p3) target bundleno = 183 (0xb7), region = 32 }
   0xc   : > { %v467_v0 = vmov 0   ;;  %v214_v1 = vld [vmem:[%s539_s2 + $0x8] sm:$0xff]  ;;  %s546_s12 = smov (!%p191_p4, %s457_s12), 1  ;;  %v213_v3 = vld [vmem:[%s539_s2] sm:$0xff]  ;;  %vm236_vm0 = vcmask 1043456   ;;  %vm229_vm1 = vcmask 31744  }
   0xd   : > { %434 = vset.pattern.permute.xlu0 %v467_v0  ;;  %s405_s18 = sshll.u32 %s546_s12, 3  ;;  %v211_v4 = vld [vmem:[%s538_s1 + $0x8] sm:$0xff]  ;;  %v210_v7 = vld [vmem:[%s538_s1] sm:$0xff]  ;;  %s406_s28 = sshll.u32 %s546_s12, 4 }
   0xe   : > { %222 = vperm.xlu0 %434, %v214_v1   ;;  %s198_s21 = scalar_lea.vmem %s537_s0, %s405_s18  ;;  %s208_s4 = scalar_lea.vmem %s540_s3, %s406_s28 }
   0xf   : > { %v212_v2 = vld [vmem:[%s198_s21] sm:$0xff] }
  0x10   : > { %226 = vst [vmem:[#allocation1] ss:$2 sm:$0xff] %v212_v2 }
  0x16   : > { %217 = vperm.xlu0 %434, %v213_v3  }
  0x17   : > { %v227_v5 = vld.sshfl [vmem:[#allocation1] sm:$0xff pattern:$0x75316420]  ;;  %v228_v6 = vld.sshfl [vmem:[#allocation1 + $0x8] sm:$0xff pattern:$0x75316420] }
  0x18   : > { %407 = vmatpush.msk.msra.mxu2 %vm236_vm0, %v227_v5  ;;  %408 = vmatpush.msk.msra.mxu3 %vm236_vm0, %v228_v6 }
  0x19   : > { %399 = vmatmul.msk.f32.vlgmr.msra.gmra.mxu2 %vm229_vm1, %v211_v4  ;;  %402 = vmatmul.msk.f32.vlgmr.msra.gmra.mxu3 %vm229_vm1, %v211_v4 }
  0x1a   : > { %397 = vmatpush.msk.msra.mxu0 %vm236_vm0, %v227_v5  ;;  %400 = vmatpush.msk.msra.mxu1 %vm236_vm0, %v228_v6 }
  0x1b   : > { %398 = vmatmul.msk.f32.vlgmr.msra.gmra.mxu0 %vm229_vm1, %v210_v7  ;;  %401 = vmatmul.msk.f32.vlgmr.msra.gmra.mxu1 %vm229_vm1, %v210_v7 }
  0x80   : > { %v223_v8 = vpop.permute.xlu0 %222 }
  0x88   : > { %v218_v21 = vpop.permute.xlu0 %217 }
  0x98   : > { %v258_v22 = vpop.f32.mrf.mxu0  ;;  %v281_v23 = vpop.f32.mrf.mxu1 }
  0x99   : > { %v259_v24 = vadd.f32 %v258_v22, %v218_v21  ;;  %v282_v26 = vadd.f32 %v281_v23, %v218_v21 }
  0x9c   : > { %v261_v9 = vpop.f32.mrf.mxu2  ;;  %v284_v10 = vpop.f32.mrf.mxu3 }
  0x9d   : > { %v262_v11 = vadd.f32 %v261_v9, %v223_v8  ;;  %v285_v12 = vadd.f32 %v284_v10, %v223_v8 }
  0x9f   : > { %v287_v13 = vsub.f32 0.0, %v262_v11  ;;  %v288_v14 = vsub.f32 0.0, %v285_v12 }
  0xa1   : > { %v289_v15 = vmul.f32 1.442695, %v287_v13  ;;  %v291_v16 = vmul.f32 1.442695, %v288_v14 }
  0xa3   : > { %435 = vpow2.f32 %v289_v15 }
  0xa4   : > { %437 = vpow2.f32 %v291_v16 }
  0xa9   : > { %v436_v17 = vpop.eup %435 }
  0xaa   : > { %v438_v18 = vpop.eup %437  ;;  %v293_v19 = vadd.f32 1.0, %v436_v17 }
  0xab   : > { %v294_v20 = vadd.f32 1.0, %v438_v18 }
  0xac   : > { %439 = vrcp.f32 %v293_v19 }
  0xad   : > { %441 = vrcp.f32 %v294_v20 }
  0xb2   : > { %v440_v25 = vpop.eup %439 }
  0xb3   : > { %v442_v27 = vpop.eup %441  ;;  %v297_v28 = vmul.f32 %v440_v25, %v259_v24 }
  0xb4   : > { %v298_v29 = vmul.f32 %v442_v27, %v282_v26 }
  0xb5   : > { %299 = vst [vmem:[%s208_s4] sm:$0xff] %v297_v28 }
  0xb6   : > { %300 = vst [vmem:[%s208_s4 + $0x8] sm:$0xff] %v298_v29 }
  0xb7 PF: > { %s13_s14 = sadd.s32 1, %s465_s14   ;;  %s541_s12 = smov %s461_s13 }
  0xb8   : > { %p10_p5 = scmp.ge.s32.totalorder %s13_s14, 4   ;;  %s542_s13 = smov %s544_s15 }
  0xba   :  { %12 = sbr.rel (!%p10_p5) target bundleno = 2 (0x2), region = 62 }

</bundles_post_ra>
